<compile_context>
chip_gen: v7x
topology: tpu7x:2x2x1
jax: 0.10.0
libtpu: 0.0.40
codegen_flags: <defaults>
</compile_context>

<pallas_src>
import jax
import jax.numpy as jnp
from jax.experimental import pallas as pl
from jax.experimental.pallas import tpu as pltpu

LANE = 128     # vreg lane width
SUBLANE = 8    # vreg sublane count (f32)


def _round_up(n, m):
    return ((n + m - 1) // m) * m


def _mlp_kernel(x_ref, w1_ref, b1_ref, w2_ref, b2_ref, o_ref):
    # x arrives unpadded f32; cast to bf16 in-kernel (rides the idle VPU slot).
    x = x_ref[...].astype(jnp.bfloat16)
    # Layer 1 on the MXU: (TM, in) bf16 @ (in, HID_P) bf16 -> f32 accumulation.
    h = jnp.dot(x, w1_ref[...], preferred_element_type=jnp.float32)
    # f32 epilogue (bias + ReLU) — native VPU path on all chips incl. v5e.
    h = jnp.maximum(h + b1_ref[...], 0.0)
    # Layer 2 on the MXU, bf16 operands / f32 accumulation, unpadded out dim.
    y = jnp.dot(h.astype(jnp.bfloat16), w2_ref[...],
                preferred_element_type=jnp.float32)
    o_ref[...] = (y + b2_ref[...]).astype(o_ref.dtype)


def _choose_tm(b_pad, block_m):
    """Fat batch tiles, but >=2 grid steps when possible (v7x has 2 TCs)."""
    half = _round_up(pl.cdiv(b_pad, 2), SUBLANE)
    return int(max(SUBLANE, min(block_m, half)))


def simple_model_forward(x, w1, b1, w2, b2, *, block_m=1024):
    """Pallas forward for SimpleModel.

    x:  (B, input_dim) float32
    w1: (input_dim, hidden_dim)   (transposed nn.Linear weight)
    b1: (1, hidden_dim)
    w2: (hidden_dim, output_dim)
    b2: (1, output_dim)
    returns (B, output_dim) float32
    """
    B, in_dim = x.shape
    hid_dim = w1.shape[1]
    out_dim = w2.shape[1]

    # Only the hidden dim is lane-padded: it exists solely as a VMEM
    # intermediate / MXU panel, never as HBM traffic.
    hid_p = _round_up(hid_dim, LANE)

    # Batch padded only to a multiple of the sublane count (<= 7 zero rows).
    b_pad = _round_up(B, SUBLANE)
    tm = _choose_tm(b_pad, block_m)
    grid = (pl.cdiv(b_pad, tm),)   # final block may be partial -> masked

    # x stays f32 and unpadded in the feature dim; weights cast once to bf16.
    x_p = jnp.pad(x, ((0, b_pad - B), (0, 0)))
    w1_p = jnp.pad(w1, ((0, 0), (0, hid_p - hid_dim))).astype(jnp.bfloat16)
    b1_p = jnp.pad(b1, ((0, 0), (0, hid_p - hid_dim))).astype(jnp.float32)
    w2_p = jnp.pad(w2, ((0, hid_p - hid_dim), (0, 0))).astype(jnp.bfloat16)
    b2_p = b2.astype(jnp.float32)

    flops = 2 * b_pad * (in_dim * hid_p + hid_p * out_dim)
    bytes_accessed = (
        x_p.size * 4 + w1_p.size * 2 + w2_p.size * 2
        + b1_p.size * 4 + b2_p.size * 4 + b_pad * out_dim * 4
    )

    out_padded = pl.pallas_call(
        _mlp_kernel,
        out_shape=jax.ShapeDtypeStruct((b_pad, out_dim), jnp.float32),
        grid=grid,
        in_specs=[
            # Batch tile advances with the grid; feature dim = full array dim.
            pl.BlockSpec((tm, in_dim), lambda i: (i, 0)),
            # Weights / biases: constant block index -> stay resident in VMEM.
            pl.BlockSpec((in_dim, hid_p), lambda i: (0, 0)),
            pl.BlockSpec((1, hid_p), lambda i: (0, 0)),
            pl.BlockSpec((hid_p, out_dim), lambda i: (0, 0)),
            pl.BlockSpec((1, out_dim), lambda i: (0, 0)),
        ],
        out_specs=pl.BlockSpec((tm, out_dim), lambda i: (i, 0)),
        compiler_params=pltpu.CompilerParams(
            dimension_semantics=("parallel",)),
        cost_estimate=pl.CostEstimate(
            flops=flops, transcendentals=0, bytes_accessed=bytes_accessed),
    )(x_p, w1_p, b1_p, w2_p, b2_p)

    # Slice back to the logical batch (out_dim is already unpadded).
    return out_padded[:B]


def init_params(key, input_dim=10, hidden_dim=5, output_dim=2):
    """Deterministic init matching nn.Linear's default U(-1/sqrt(fan_in), +1/sqrt(fan_in))."""
    k1, k2, k3, k4 = jax.random.split(key, 4)
    lim1 = 1.0 / jnp.sqrt(jnp.float32(input_dim))
    lim2 = 1.0 / jnp.sqrt(jnp.float32(hidden_dim))
    # Stored pre-transposed as (in, out) so the kernel does x @ W.
    w1 = jax.random.uniform(k1, (input_dim, hidden_dim), jnp.float32, -lim1, lim1)
    b1 = jax.random.uniform(k2, (1, hidden_dim), jnp.float32, -lim1, lim1)
    w2 = jax.random.uniform(k3, (hidden_dim, output_dim), jnp.float32, -lim2, lim2)
    b2 = jax.random.uniform(k4, (1, output_dim), jnp.float32, -lim2, lim2)
    return w1, b1, w2, b2


def _ref_forward_bf16(x, w1, b1, w2, b2):
    """Pure-JAX reference mirroring the kernel's bf16-operand / f32-acc path."""
    h = jnp.dot(x.astype(jnp.bfloat16), w1.astype(jnp.bfloat16),
                preferred_element_type=jnp.float32) + b1
    h = jnp.maximum(h, 0.0)
    return jnp.dot(h.astype(jnp.bfloat16), w2.astype(jnp.bfloat16),
                   preferred_element_type=jnp.float32) + b2


if __name__ == "__main__":
    key = jax.random.PRNGKey(0)
    k_params, k_x, k_x2 = jax.random.split(key, 3)

    input_dim, hidden_dim, output_dim = 10, 5, 2
    batch = 8

    w1, b1, w2, b2 = init_params(k_params, input_dim, hidden_dim, output_dim)
    x = jax.random.normal(k_x, (batch, input_dim), jnp.float32)

    out = jax.block_until_ready(simple_model_forward(x, w1, b1, w2, b2))
    assert out.shape == (batch, output_dim)

    # Exact-path reference (bf16 operands, f32 accumulation).
    ref_bf16 = _ref_forward_bf16(x, w1, b1, w2, b2)
    assert jnp.allclose(out, ref_bf16, atol=1e-4, rtol=1e-4)

    # Sanity against pure-f32 math (loose tol for bf16 rounding).
    ref_f32 = jnp.maximum(x @ w1 + b1, 0.0) @ w2 + b2
    assert jnp.allclose(out, ref_f32, atol=5e-2, rtol=5e-2)

    # Multi-step grid with a partial (masked) final block:
    # B=260 -> b_pad=264, tm=136, grid=2.
    x_big = jax.random.normal(k_x2, (260, input_dim), jnp.float32)
    out_big = jax.block_until_ready(simple_model_forward(x_big, w1, b1, w2, b2))
    assert out_big.shape == (260, output_dim)
    assert jnp.allclose(out_big, _ref_forward_bf16(x_big, w1, b1, w2, b2),
                        atol=1e-4, rtol=1e-4)

    print("KERNEL_OK")
</pallas_src>

<mosaic_0001>
module attributes {stable_mosaic.version = 11 : i64} {
  func.func @_mlp_kernel(%arg0: i32, %arg1: memref<8x10xf32, #tpu.memory_space<vmem>>, %arg2: memref<10x128xbf16, #tpu.memory_space<vmem>>, %arg3: memref<1x128xf32, #tpu.memory_space<vmem>>, %arg4: memref<128x2xbf16, #tpu.memory_space<vmem>>, %arg5: memref<1x2xf32, #tpu.memory_space<vmem>>, %arg6: memref<8x2xf32, #tpu.memory_space<vmem>>) attributes {dimension_semantics = [#tpu.dimension_semantics<parallel>], iteration_bounds = array<i64: 1>, scalar_prefetch = 0 : i64, scratch_operands = 0 : i64, tpu.core_type = #tpu.core_type<tc>, window_params = [{transform_indices = @transform_0, window_bounds = array<i64: 8, 10>}, {pipeline_mode = #tpu.pipeline_mode<synchronous>, transform_indices = @transform_1, window_bounds = array<i64: 10, 128>}, {pipeline_mode = #tpu.pipeline_mode<synchronous>, transform_indices = @transform_2, window_bounds = array<i64: 1, 128>}, {pipeline_mode = #tpu.pipeline_mode<synchronous>, transform_indices = @transform_3, window_bounds = array<i64: 128, 2>}, {pipeline_mode = #tpu.pipeline_mode<synchronous>, transform_indices = @transform_4, window_bounds = array<i64: 1, 2>}, {transform_indices = @transform_5, window_bounds = array<i64: 8, 2>}]} {
    %c0 = arith.constant 0 : index
    %c0_0 = arith.constant 0 : index
    %0 = vector.load %arg1[%c0, %c0_0] : memref<8x10xf32, #tpu.memory_space<vmem>>, vector<8x10xf32>
    %1 = arith.truncf %0 : vector<8x10xf32> to vector<8x10xbf16>
    %c0_1 = arith.constant 0 : index
    %c0_2 = arith.constant 0 : index
    %2 = vector.load %arg2[%c0_1, %c0_2] : memref<10x128xbf16, #tpu.memory_space<vmem>>, vector<10x128xbf16>
    %cst = arith.constant dense<0.000000e+00> : vector<8x128xf32>
    %3 = tpu.matmul %1, %2, %cst {dimension_numbers = #tpu.dot_dimension_numbers<[1], [0], [0], [1], [0, 0, 1, 1], [], []>} : vector<8x10xbf16>, vector<10x128xbf16>, vector<8x128xf32> -> vector<8x128xf32>
    %c0_3 = arith.constant 0 : index
    %c0_4 = arith.constant 0 : index
    %4 = vector.load %arg3[%c0_3, %c0_4] : memref<1x128xf32, #tpu.memory_space<vmem>>, vector<1x128xf32>
    %5 = vector.broadcast %4 : vector<1x128xf32> to vector<8x128xf32>
    %6 = arith.addf %3, %5 : vector<8x128xf32>
    %cst_5 = arith.constant 0.000000e+00 : f32
    %7 = vector.broadcast %cst_5 : f32 to vector<8x128xf32>
    %8 = arith.maximumf %6, %7 : vector<8x128xf32>
    %9 = arith.truncf %8 : vector<8x128xf32> to vector<8x128xbf16>
    %c0_6 = arith.constant 0 : index
    %c0_7 = arith.constant 0 : index
    %10 = vector.load %arg4[%c0_6, %c0_7] : memref<128x2xbf16, #tpu.memory_space<vmem>>, vector<128x2xbf16>
    %cst_8 = arith.constant dense<0.000000e+00> : vector<8x2xf32>
    %11 = tpu.matmul %9, %10, %cst_8 {dimension_numbers = #tpu.dot_dimension_numbers<[1], [0], [0], [1], [0, 0, 1, 1], [], []>} : vector<8x128xbf16>, vector<128x2xbf16>, vector<8x2xf32> -> vector<8x2xf32>
    %c0_9 = arith.constant 0 : index
    %c0_10 = arith.constant 0 : index
    %12 = vector.load %arg5[%c0_9, %c0_10] : memref<1x2xf32, #tpu.memory_space<vmem>>, vector<1x2xf32>
    %13 = vector.broadcast %12 : vector<1x2xf32> to vector<8x2xf32>
    %14 = arith.addf %11, %13 : vector<8x2xf32>
    %c0_11 = arith.constant 0 : index
    %c0_12 = arith.constant 0 : index
    %15 = vector.load %arg6[%c0_11, %c0_12] : memref<8x2xf32, #tpu.memory_space<vmem>>, vector<8x2xf32>
    tpu.vector_store %arg6[%c0_11, %c0_12], %14 {strides = array<i32>} : memref<8x2xf32, #tpu.memory_space<vmem>>, vector<8x2xf32>,
    return
  }
  func.func @transform_0(%arg0: i32) -> (i32, i32) {
    %c0_i32 = arith.constant 0 : i32
    %c0_i32_0 = arith.constant 0 : i32
    return %arg0, %c0_i32 : i32, i32
  }
  func.func @transform_1(%arg0: i32) -> (i32, i32) {
    %c0_i32 = arith.constant 0 : i32
    %c0_i32_0 = arith.constant 0 : i32
    %c0_i32_1 = arith.constant 0 : i32
    return %c0_i32, %c0_i32_0 : i32, i32
  }
  func.func @transform_2(%arg0: i32) -> (i32, i32) {
    %c0_i32 = arith.constant 0 : i32
    %c0_i32_0 = arith.constant 0 : i32
    %c0_i32_1 = arith.constant 0 : i32
    return %c0_i32, %c0_i32_0 : i32, i32
  }
  func.func @transform_3(%arg0: i32) -> (i32, i32) {
    %c0_i32 = arith.constant 0 : i32
    %c0_i32_0 = arith.constant 0 : i32
    %c0_i32_1 = arith.constant 0 : i32
    return %c0_i32, %c0_i32_0 : i32, i32
  }
  func.func @transform_4(%arg0: i32) -> (i32, i32) {
    %c0_i32 = arith.constant 0 : i32
    %c0_i32_0 = arith.constant 0 : i32
    %c0_i32_1 = arith.constant 0 : i32
    return %c0_i32, %c0_i32_0 : i32, i32
  }
  func.func @transform_5(%arg0: i32) -> (i32, i32) {
    %c0_i32 = arith.constant 0 : i32
    %c0_i32_0 = arith.constant 0 : i32
    return %arg0, %c0_i32 : i32, i32
  }
}

</mosaic_0001>

<bundles_post_ra>
// kernel: tpu_custom_call.1
= control target key start
LH: loop header
LB: loop body
LE: loop exit
PB: predicated region body
PF: predicated region fallthrough
CT: control target
= control target key end

     0   :  { %vm41_vm0 = vcmask 1044480   ;;  %v264_v0 = vmov 0.0   ;;  %vm265_vm1 = vmmov 0   ;;  %vm37_vm2 = vcmask 80896   ;;  %s335_s1 = inlined_call_operand.vmem [shape: bf16[10,128], index: 1, kind: input, shape index: {}]   ;;  %s336_s0 = inlined_call_operand.vmem [shape: f32[8,10], index: 0, kind: input, shape index: {}]   ;;  %s337_s3 = inlined_call_operand.vmem [shape: bf16[128,2], index: 3, kind: input, shape index: {}]   ;;  %s338_s2 = inlined_call_operand.vmem [shape: f32[1,128], index: 2, kind: input, shape index: {}]   ;;  %s339_s4 = inlined_call_operand.vmem [shape: f32[1,2], index: 4, kind: input, shape index: {}]   ;;  %s340_s5 = inlined_call_operand.vmem [shape: f32[8,2], index: 5, kind: output, shape index: {}]  }
   0x1   :  { %227 = vmatprep.subr.bf16.mxu0 %v264_v0  ;;  %v255_v1 = vld [vmem:[%s335_s1] sm:$0x1f]   ;;  %229 = vmatprep.mubr.msk.bf16.mxu0 %vm265_vm1, %v264_v0  ;;  %v257_v6 = vld [vmem:[%s337_s3 + $0x8] sm:$0xff]   ;;  %v258_v7 = vld [vmem:[%s337_s3 + $0x10] sm:$0xff]   ;;  %vm198_vm3 = vcmask 15360  }
   0x2   :  { %v21_v2 = vld [vmem:[%s336_s0] sm:$0xff]  ;;  %233 = vmatprep.subr.bf16.mxu1 %v264_v0  ;;  %249 = vmatprep.mubr.msk.bf16.mxu1 %vm265_vm1, %v264_v0  ;;  %v43_v3 = vsel %vm41_vm0, %v255_v1, 0  ;;  %v259_v8 = vld [vmem:[%s337_s3 + $0x18] sm:$0xff]   ;;  %v261_v10 = vld [vmem:[%s337_s3 + $0x28] sm:$0xff]  }
   0x3   :  { %v22_v4 = vpack.c.bf16 %v21_v2, %v21_v2  ;;  %v256_v5 = vld [vmem:[%s337_s3] sm:$0xff]   ;;  %228 = vmatpush3.bf16.msra.mxu0 %v43_v3  ;;  %v262_v11 = vld [vmem:[%s337_s3 + $0x30] sm:$0xff]   ;;  %v263_v12 = vld [vmem:[%s337_s3 + $0x38] sm:$0xff]  }
   0x4   :  { %234 = vmatpush3.bf16.msra.mxu1 %v256_v5  ;;  %v260_v9 = vld [vmem:[%s337_s3 + $0x20] sm:$0xff]  }
   0x5   :  { %235 = vmatprep.subr.bf16.mxu1 %v264_v0  ;;  %v204_v13 = vld [vmem:[%s338_s2] ss:$0 sm:$0xff] }
   0x6   :  { %230 = vmatmul.mubr.msk.bf16.vlgmr.msra.gmra.mrb[0].mxu0 %vm37_vm2, %v22_v4  ;;  %v207_v21 = vld [vmem:[%s339_s4] ss:$0 sm:$0xff] }
   0x8   :  { %236 = vmatpush3.bf16.msra.mxu1 %v257_v6 }
   0x9   :  { %237 = vmatprep.subr.bf16.mxu1 %v264_v0 }
   0xc   :  { %238 = vmatpush3.bf16.msra.mxu1 %v258_v7 }
   0xd   :  { %239 = vmatprep.subr.bf16.mxu1 %v264_v0 }
  0x10   :  { %240 = vmatpush3.bf16.msra.mxu1 %v259_v8 }
  0x11   :  { %241 = vmatprep.subr.bf16.mxu1 %v264_v0 }
  0x14   :  { %242 = vmatpush3.bf16.msra.mxu1 %v260_v9 }
  0x15   :  { %243 = vmatprep.subr.bf16.mxu1 %v264_v0 }
  0x18   :  { %244 = vmatpush3.bf16.msra.mxu1 %v261_v10 }
  0x19   :  { %245 = vmatprep.subr.bf16.mxu1 %v264_v0 }
  0x1c   :  { %246 = vmatpush3.bf16.msra.mxu1 %v262_v11 }
  0x1d   :  { %247 = vmatprep.subr.bf16.mxu1 %v264_v0 }
  0x20   :  { %248 = vmatpush3.bf16.msra.mxu1 %v263_v12 }
  0xd9   :  { %v79_v14 = vpop.f32.mrb[0].mxu0 }
  0xda   :  { %v80_v15 = vadd.f32 %v204_v13, %v79_v14  ;;  %v231_v16 = vpop.f32.mrb[1].mxu0 }
  0xdb   :  { %v82_v17 = vpop.f32.mrb[2].mxu0 }
  0xdc   :  { %v85_v18 = vmax.f32 %v80_v15, 0.0  ;;  %v232_v19 = vpop.f32.mrb[3].mxu0 }
  0xde   :  { %v86_v20 = vpack.c.bf16 %v85_v18, %v85_v18 }
  0xe0   :  { %250 = vmatmul.mubr.bf16.vlgmr.msra.gmra.mrb[0].mxu1 %v86_v20 }
 0x1b3   :  { %v192_v22 = vpop.f32.mrb[0].mxu1 }
 0x1b4   :  { %v193_v23 = vadd.f32 %v207_v21, %v192_v22  ;;  %v251_v24 = vpop.f32.mrb[1].mxu1 }
 0x1b5   :  { %v195_v25 = vpop.f32.mrb[2].mxu1 }
 0x1b6   :  { %199 = vst.msk [vmem:[%s340_s5] sm:$0xff] %vm198_vm3, %v193_v23  ;;  %v252_v26 = vpop.f32.mrb[3].mxu1 }

</bundles_post_ra>
